<compile_context>
chip_gen: v5e
topology: v5e:2x2
jax: 0.10.0
libtpu: 0.0.40
codegen_flags: <defaults>
</compile_context>

<pallas_src>
import math
from functools import partial

import jax
import jax.numpy as jnp
from jax import lax
from jax.experimental import pallas as pl
from jax.experimental.pallas import tpu as pltpu


def _round_up(x, m):
    return (x + m - 1) // m * m


def _pad_axis(x, axis, target):
    pad = target - x.shape[axis]
    if pad == 0:
        return x
    widths = [(0, 0)] * x.ndim
    widths[axis] = (0, pad)
    return jnp.pad(x, widths)


def _attention_layer_kernel(q_ref, k_ref, v_ref, wo_ref, bo_ref,
                            o_ref, acc_ref, *, compute_dtype):
    # Per-grid-step (b, l, h) shapes (leading block dims squeezed by BlockSpec):
    #   q_ref  : (TILE_L, E)   scale already folded into the Q projection
    #   k_ref  : (S, E)        pre-projected per head (wrapper)
    #   v_ref  : (S, Dv)       pre-projected per head (wrapper)
    #   wo_ref : (Dv, D_pad)   this head's slice of the output projection
    #   bo_ref : (1, D_pad)
    #   o_ref  : (TILE_L, D_pad)   acc_ref : (TILE_L, D_pad) f32 scratch
    h = pl.program_id(2)
    f32 = jnp.float32

    @pl.when(h == 0)
    def _init():
        acc_ref[...] = jnp.zeros_like(acc_ref)

    q = q_ref[...]
    k = k_ref[...]
    v = v_ref[...]

    # Scores without materializing k.T (no XLU transpose on the critical path).
    s = lax.dot_general(q, k, dimension_numbers=(((1,), (1,)), ((), ())),
                        preferred_element_type=f32)            # (TILE_L, S)

    # Numerically-stable softmax, kept in f32.
    s = s - jnp.max(s, axis=-1, keepdims=True)
    p = jnp.exp(s)                                             # unnormalized probs
    denom = jnp.sum(p, axis=-1, keepdims=True)
    inv = pl.reciprocal(denom, approx=True)                    # EUP slot (off the VPU)
    inv = inv * (2.0 - denom * inv)                            # one Newton step

    # PV first, then normalize the small (TILE_L, Dv) context instead of the
    # (TILE_L, S) probability tile.
    ctx = jnp.dot(p.astype(compute_dtype), v,
                  preferred_element_type=f32)                  # (TILE_L, Dv)
    ctx = ctx * inv

    # This head's slice of the output projection, accumulated over the head axis.
    # TODO(synk): group G heads per grid step so this contraction is G*Dv wide
    # (better MXU fill) for configs with small per-head Dv.
    acc_ref[...] += jnp.dot(ctx.astype(compute_dtype), wo_ref[...],
                            preferred_element_type=f32)

    @pl.when(h == pl.num_programs(2) - 1)
    def _finalize():
        o_ref[...] = (acc_ref[...] + bo_ref[...]).astype(o_ref.dtype)


@partial(jax.jit, static_argnames=("n_heads", "compute_dtype", "tile_l"))
def attention_layer_pallas(queries, keys, values, params, n_heads,
                           compute_dtype=jnp.float32, tile_l=256):
    """queries: (B, L, d_model), keys/values: (B, S, d_model) -> (B, L, d_model)."""
    B, L, d_model = queries.shape
    _, S, _ = keys.shape

    wq, bq = params["wq"], params["bq"]   # wq: (d_model, H*E),  bq: (1, H*E)
    wk, bk = params["wk"], params["bk"]
    wv, bv = params["wv"], params["bv"]   # wv: (d_model, H*Dv), bv: (1, H*Dv)
    wo, bo = params["wo"], params["bo"]   # wo: (H*Dv, d_model), bo: (1, d_model)

    H = n_heads
    E = wq.shape[1] // H
    Dv = wv.shape[1] // H
    scale = 1.0 / math.sqrt(E)

    # ---- tiling choices --------------------------------------------------------
    D_pad = _round_up(d_model, 128)                      # lane-dense output dim
    tl = max(8, min(_round_up(tile_l, 8), _round_up(L, 8)))
    L_pad = _round_up(L, tl)
    n_l = L_pad // tl
    # v7x megacore: make sure the two "parallel" grid axes expose >= 2 work units.
    if B * n_l < 2 and L > 8:
        tl = max(8, _round_up(pl.cdiv(L, 2), 8))
        L_pad = _round_up(L, tl)
        n_l = L_pad // tl

    # ---- wrapper-side projections (full-width XLA matmuls, computed once) ------
    # Softmax scale folded into the Q projection; K/V projections hoisted out of
    # the kernel so they are not recomputed per L tile, and the kernel's K/V
    # residency drops to (S, E) + (S, Dv) per head.
    q_proj = ((queries @ wq + bq) * scale).reshape(B, L, H, E).transpose(0, 2, 1, 3)
    k_proj = (keys @ wk + bk).reshape(B, S, H, E).transpose(0, 2, 1, 3)
    v_proj = (values @ wv + bv).reshape(B, S, H, Dv).transpose(0, 2, 1, 3)
    q_proj = _pad_axis(q_proj, 2, L_pad).astype(compute_dtype)   # (B, H, L_pad, E)
    k_proj = k_proj.astype(compute_dtype)                        # (B, H, S, E)
    v_proj = v_proj.astype(compute_dtype)                        # (B, H, S, Dv)

    wo_r = _pad_axis(wo, 1, D_pad).reshape(H, Dv, D_pad).astype(compute_dtype)
    bo_p = _pad_axis(bo, 1, D_pad).astype(jnp.float32)           # (1, D_pad)

    kernel = partial(_attention_layer_kernel, compute_dtype=compute_dtype)

    out = pl.pallas_call(
        kernel,
        out_shape=jax.ShapeDtypeStruct((B, L_pad, D_pad), queries.dtype),
        grid_spec=pltpu.PrefetchScalarGridSpec(
            num_scalar_prefetch=0,
            grid=(B, n_l, H),                            # head (reduction) axis last
            in_specs=[
                pl.BlockSpec((None, None, tl, E), lambda b, l, h: (b, h, l, 0)),   # Q
                pl.BlockSpec((None, None, S, E), lambda b, l, h: (b, h, 0, 0)),    # K
                pl.BlockSpec((None, None, S, Dv), lambda b, l, h: (b, h, 0, 0)),   # V
                pl.BlockSpec((None, Dv, D_pad), lambda b, l, h: (h, 0, 0)),        # Wo
                pl.BlockSpec((1, D_pad), lambda b, l, h: (0, 0)),                  # bo
            ],
            out_specs=pl.BlockSpec((None, tl, D_pad), lambda b, l, h: (b, l, 0)),
            scratch_shapes=[pltpu.VMEM((tl, D_pad), jnp.float32)],
        ),
        compiler_params=pltpu.CompilerParams(
            dimension_semantics=("parallel", "parallel", "arbitrary"),
            vmem_limit_bytes=64 * 1024 * 1024,           # v5e/v6e headroom; == v7x physical
        ),
    )(q_proj, k_proj, v_proj, wo_r, bo_p)

    # TODO(synk): for very long S, an online-softmax (flash-style) S-tile inner loop
    # would bound the (TILE_L, S) score/prob intermediates and K/V residency.
    # S is intentionally NOT padded (zero-padded keys would corrupt the softmax
    # denominator without an explicit -inf mask).
    return out[:, :L, :d_model]


def attention_layer_reference(queries, keys, values, params, n_heads):
    """Pure-JAX reference mirroring the PyTorch module (eval mode)."""
    B, L, _ = queries.shape
    _, S, _ = keys.shape
    wq, bq = params["wq"], params["bq"]
    wk, bk = params["wk"], params["bk"]
    wv, bv = params["wv"], params["bv"]
    wo, bo = params["wo"], params["bo"]
    H = n_heads
    E = wq.shape[1] // H
    Dv = wv.shape[1] // H

    Q = (queries @ wq + bq).reshape(B, L, H, E)
    K = (keys @ wk + bk).reshape(B, S, H, E)
    V = (values @ wv + bv).reshape(B, S, H, Dv)
    scale = 1.0 / math.sqrt(E)
    scores = jnp.einsum("blhe,bshe->bhls", Q, K)
    A = jax.nn.softmax(scale * scores, axis=-1)
    O = jnp.einsum("bhls,bshd->blhd", A, V).reshape(B, L, H * Dv)
    return O @ wo + bo


def init_params(key, d_model, n_heads):
    d_keys = d_model // n_heads
    d_values = d_model // n_heads
    ks = jax.random.split(key, 8)

    def lin(wkey, bkey, fan_in, fan_out):
        bound = 1.0 / math.sqrt(fan_in)
        w = jax.random.uniform(wkey, (fan_in, fan_out), jnp.float32, -bound, bound)
        b = jax.random.uniform(bkey, (1, fan_out), jnp.float32, -bound, bound)
        return w, b

    wq, bq = lin(ks[0], ks[1], d_model, d_keys * n_heads)
    wk, bk = lin(ks[2], ks[3], d_model, d_keys * n_heads)
    wv, bv = lin(ks[4], ks[5], d_model, d_values * n_heads)
    wo, bo = lin(ks[6], ks[7], d_values * n_heads, d_model)
    return dict(wq=wq, bq=bq, wk=wk, bk=bk, wv=wv, bv=bv, wo=wo, bo=bo)


if __name__ == "__main__":
    B, L, S = 2, 8, 8
    d_model, n_heads = 32, 4

    key = jax.random.PRNGKey(0)
    kq, kk, kv, kp = jax.random.split(key, 4)
    queries = jax.random.normal(kq, (B, L, d_model), jnp.float32)
    keys_in = jax.random.normal(kk, (B, S, d_model), jnp.float32)
    values_in = jax.random.normal(kv, (B, S, d_model), jnp.float32)
    params = init_params(kp, d_model, n_heads)

    ref = attention_layer_reference(queries, keys_in, values_in, params, n_heads)

    # f32 compute path (strict check).
    out = attention_layer_pallas(queries, keys_in, values_in, params, n_heads=n_heads)
    out = jax.block_until_ready(out)
    assert out.shape == (B, L, d_model)
    assert jnp.allclose(out, ref, atol=5e-4, rtol=5e-4), "f32 mismatch vs reference"

    # bf16 MXU-input path (recommended on v6e / v7x); softmax & accumulation stay f32.
    out_bf16 = attention_layer_pallas(queries, keys_in, values_in, params,
                                      n_heads=n_heads, compute_dtype=jnp.bfloat16)
    out_bf16 = jax.block_until_ready(out_bf16)
    assert jnp.allclose(out_bf16, ref, atol=5e-2, rtol=5e-2), "bf16 mismatch vs reference"

    print("KERNEL_OK")
</pallas_src>

<mosaic_0001>
module attributes {stable_mosaic.version = 11 : i64} {
  func.func @_attention_layer_kernel(%arg0: i32, %arg1: i32, %arg2: i32, %arg3: memref<1x1x8x8xf32, #tpu.memory_space<vmem>>, %arg4: memref<1x1x8x8xf32, #tpu.memory_space<vmem>>, %arg5: memref<1x1x8x8xf32, #tpu.memory_space<vmem>>, %arg6: memref<1x8x128xf32, #tpu.memory_space<vmem>>, %arg7: memref<1x128xf32, #tpu.memory_space<vmem>>, %arg8: memref<1x8x128xf32, #tpu.memory_space<vmem>>, %arg9: memref<8x128xf32, #tpu.memory_space<vmem>>) attributes {dimension_semantics = [#tpu.dimension_semantics<parallel>, #tpu.dimension_semantics<parallel>, #tpu.dimension_semantics<arbitrary>], iteration_bounds = array<i64: 2, 1, 4>, scalar_prefetch = 0 : i64, scratch_operands = 1 : i64, tpu.core_type = #tpu.core_type<tc>, window_params = [{transform_indices = @transform_0, window_bounds = array<i64: 1, 1, 8, 8>}, {transform_indices = @transform_1, window_bounds = array<i64: 1, 1, 8, 8>}, {transform_indices = @transform_2, window_bounds = array<i64: 1, 1, 8, 8>}, {transform_indices = @transform_3, window_bounds = array<i64: 1, 8, 128>}, {pipeline_mode = #tpu.pipeline_mode<synchronous>, transform_indices = @transform_4, window_bounds = array<i64: 1, 128>}, {transform_indices = @transform_5, window_bounds = array<i64: 1, 8, 128>}]} {
    %c0_i32 = arith.constant 0 : i32
    %0 = arith.cmpi eq, %arg2, %c0_i32 : i32
    %1 = arith.extui %0 : i1 to i32
    %c0_i32_0 = arith.constant 0 : i32
    %2 = arith.cmpi ne, %1, %c0_i32_0 : i32
    scf.if %2 {
      %cst_25 = arith.constant 0.000000e+00 : f32
      %34 = vector.broadcast %cst_25 : f32 to vector<8x128xf32>
      %c0_26 = arith.constant 0 : index
      %c0_27 = arith.constant 0 : index
      %35 = vector.load %arg9[%c0_26, %c0_27] : memref<8x128xf32, #tpu.memory_space<vmem>>, vector<8x128xf32>
      tpu.vector_store %arg9[%c0_26, %c0_27], %34 {strides = array<i32>} : memref<8x128xf32, #tpu.memory_space<vmem>>, vector<8x128xf32>,
    } else {
    }
    %c0 = arith.constant 0 : index
    %c0_1 = arith.constant 0 : index
    %c0_2 = arith.constant 0 : index
    %c0_3 = arith.constant 0 : index
    %3 = vector.load %arg3[%c0, %c0_1, %c0_2, %c0_3] : memref<1x1x8x8xf32, #tpu.memory_space<vmem>>, vector<1x1x8x8xf32>
    %4 = vector.shape_cast %3 : vector<1x1x8x8xf32> to vector<8x8xf32>
    %c0_4 = arith.constant 0 : index
    %c0_5 = arith.constant 0 : index
    %c0_6 = arith.constant 0 : index
    %c0_7 = arith.constant 0 : index
    %5 = vector.load %arg4[%c0_4, %c0_5, %c0_6, %c0_7] : memref<1x1x8x8xf32, #tpu.memory_space<vmem>>, vector<1x1x8x8xf32>
    %6 = vector.shape_cast %5 : vector<1x1x8x8xf32> to vector<8x8xf32>
    %c0_8 = arith.constant 0 : index
    %c0_9 = arith.constant 0 : index
    %c0_10 = arith.constant 0 : index
    %c0_11 = arith.constant 0 : index
    %7 = vector.load %arg5[%c0_8, %c0_9, %c0_10, %c0_11] : memref<1x1x8x8xf32, #tpu.memory_space<vmem>>, vector<1x1x8x8xf32>
    %8 = vector.shape_cast %7 : vector<1x1x8x8xf32> to vector<8x8xf32>
    %cst = arith.constant dense<0.000000e+00> : vector<8x8xf32>
    %9 = tpu.matmul %4, %6, %cst {dimension_numbers = #tpu.dot_dimension_numbers<[1], [1], [0], [0], [0, 0, 1, 0], [], []>} : vector<8x8xf32>, vector<8x8xf32>, vector<8x8xf32> -> vector<8x8xf32>
    %cst_12 = arith.constant dense<0xFF800000> : vector<8xf32>
    %10 = vector.multi_reduction <maximumf>, %9, %cst_12 [1] : vector<8x8xf32> to vector<8xf32>
    %11 = vector.shape_cast %10 : vector<8xf32> to vector<8x1xf32>
    %12 = vector.broadcast %11 : vector<8x1xf32> to vector<8x8xf32>
    %13 = arith.subf %9, %12 : vector<8x8xf32>
    %14 = math.exp %13 : vector<8x8xf32>
    %cst_13 = arith.constant dense<0.000000e+00> : vector<8xf32>
    %15 = vector.multi_reduction <add>, %14, %cst_13 [1] : vector<8x8xf32> to vector<8xf32>
    %16 = vector.shape_cast %15 : vector<8xf32> to vector<8x1xf32>
    %17 = tpu.reciprocal %16 {approx = true} : vector<8x1xf32> -> vector<8x1xf32>
    %18 = arith.mulf %16, %17 : vector<8x1xf32>
    %cst_14 = arith.constant 2.000000e+00 : f32
    %19 = vector.broadcast %cst_14 : f32 to vector<8x1xf32>
    %20 = arith.subf %19, %18 : vector<8x1xf32>
    %21 = arith.mulf %17, %20 : vector<8x1xf32>
    %cst_15 = arith.constant dense<0.000000e+00> : vector<8x8xf32>
    %22 = tpu.matmul %14, %8, %cst_15 {dimension_numbers = #tpu.dot_dimension_numbers<[1], [0], [0], [1], [0, 0, 1, 1], [], []>} : vector<8x8xf32>, vector<8x8xf32>, vector<8x8xf32> -> vector<8x8xf32>
    %23 = vector.broadcast %21 : vector<8x1xf32> to vector<8x8xf32>
    %24 = arith.mulf %22, %23 : vector<8x8xf32>
    %c0_16 = arith.constant 0 : index
    %c0_17 = arith.constant 0 : index
    %25 = vector.load %arg9[%c0_16, %c0_17] : memref<8x128xf32, #tpu.memory_space<vmem>>, vector<8x128xf32>
    %c0_18 = arith.constant 0 : index
    %c0_19 = arith.constant 0 : index
    %c0_20 = arith.constant 0 : index
    %26 = vector.load %arg6[%c0_18, %c0_19, %c0_20] : memref<1x8x128xf32, #tpu.memory_space<vmem>>, vector<1x8x128xf32>
    %27 = vector.shape_cast %26 : vector<1x8x128xf32> to vector<8x128xf32>
    %cst_21 = arith.constant dense<0.000000e+00> : vector<8x128xf32>
    %28 = tpu.matmul %24, %27, %cst_21 {dimension_numbers = #tpu.dot_dimension_numbers<[1], [0], [0], [1], [0, 0, 1, 1], [], []>} : vector<8x8xf32>, vector<8x128xf32>, vector<8x128xf32> -> vector<8x128xf32>
    %29 = arith.addf %25, %28 : vector<8x128xf32>
    %c0_22 = arith.constant 0 : index
    %c0_23 = arith.constant 0 : index
    %30 = vector.load %arg9[%c0_22, %c0_23] : memref<8x128xf32, #tpu.memory_space<vmem>>, vector<8x128xf32>
    tpu.vector_store %arg9[%c0_22, %c0_23], %29 {strides = array<i32>} : memref<8x128xf32, #tpu.memory_space<vmem>>, vector<8x128xf32>,
    %c3_i32 = arith.constant 3 : i32
    %31 = arith.cmpi eq, %arg2, %c3_i32 : i32
    %32 = arith.extui %31 : i1 to i32
    %c0_i32_24 = arith.constant 0 : i32
    %33 = arith.cmpi ne, %32, %c0_i32_24 : i32
    scf.if %33 {
      %c0_25 = arith.constant 0 : index
      %c0_26 = arith.constant 0 : index
      %34 = vector.load %arg9[%c0_25, %c0_26] : memref<8x128xf32, #tpu.memory_space<vmem>>, vector<8x128xf32>
      %c0_27 = arith.constant 0 : index
      %c0_28 = arith.constant 0 : index
      %35 = vector.load %arg7[%c0_27, %c0_28] : memref<1x128xf32, #tpu.memory_space<vmem>>, vector<1x128xf32>
      %36 = vector.broadcast %35 : vector<1x128xf32> to vector<8x128xf32>
      %37 = arith.addf %34, %36 : vector<8x128xf32>
      %c0_29 = arith.constant 0 : index
      %c0_30 = arith.constant 0 : index
      %c0_31 = arith.constant 0 : index
      %38 = vector.load %arg8[%c0_29, %c0_30, %c0_31] : memref<1x8x128xf32, #tpu.memory_space<vmem>>, vector<1x8x128xf32>
      %39 = vector.shape_cast %38 : vector<1x8x128xf32> to vector<8x128xf32>
      %40 = vector.shape_cast %37 : vector<8x128xf32> to vector<1x8x128xf32>
      tpu.vector_store %arg8[%c0_29, %c0_30, %c0_31], %40 {strides = array<i32>} : memref<1x8x128xf32, #tpu.memory_space<vmem>>, vector<1x8x128xf32>,
    } else {
    }
    return
  }
  func.func @transform_0(%arg0: i32, %arg1: i32, %arg2: i32) -> (i32, i32, i32, i32) {
    %c0_i32 = arith.constant 0 : i32
    %c0_i32_0 = arith.constant 0 : i32
    return %arg0, %arg2, %arg1, %c0_i32 : i32, i32, i32, i32
  }
  func.func @transform_1(%arg0: i32, %arg1: i32, %arg2: i32) -> (i32, i32, i32, i32) {
    %c0_i32 = arith.constant 0 : i32
    %c0_i32_0 = arith.constant 0 : i32
    %c0_i32_1 = arith.constant 0 : i32
    return %arg0, %arg2, %c0_i32, %c0_i32_0 : i32, i32, i32, i32
  }
  func.func @transform_2(%arg0: i32, %arg1: i32, %arg2: i32) -> (i32, i32, i32, i32) {
    %c0_i32 = arith.constant 0 : i32
    %c0_i32_0 = arith.constant 0 : i32
    %c0_i32_1 = arith.constant 0 : i32
    return %arg0, %arg2, %c0_i32, %c0_i32_0 : i32, i32, i32, i32
  }
  func.func @transform_3(%arg0: i32, %arg1: i32, %arg2: i32) -> (i32, i32, i32) {
    %c0_i32 = arith.constant 0 : i32
    %c0_i32_0 = arith.constant 0 : i32
    %c0_i32_1 = arith.constant 0 : i32
    return %arg2, %c0_i32, %c0_i32_0 : i32, i32, i32
  }
  func.func @transform_4(%arg0: i32, %arg1: i32, %arg2: i32) -> (i32, i32) {
    %c0_i32 = arith.constant 0 : i32
    %c0_i32_0 = arith.constant 0 : i32
    %c0_i32_1 = arith.constant 0 : i32
    return %c0_i32, %c0_i32_0 : i32, i32
  }
  func.func @transform_5(%arg0: i32, %arg1: i32, %arg2: i32) -> (i32, i32, i32) {
    %c0_i32 = arith.constant 0 : i32
    %c0_i32_0 = arith.constant 0 : i32
    return %arg0, %arg1, %c0_i32 : i32, i32, i32
  }
}

</mosaic_0001>

<bundles_post_ra>
// kernel: attention_layer_pallas.1
= control target key start
LH: loop header
LB: loop body
LE: loop exit
PB: predicated region body
PF: predicated region fallthrough
CT: control target
= control target key end

     0   :  { %10 = vsyncpa [#allocation4], 0  ;;  %s980_s0 = inlined_call_operand.vmem [shape: f32[2,4,8,8], index: 0, kind: input, shape index: {}]   ;;  %s981_s1 = inlined_call_operand.vmem [shape: f32[2,4,8,8], index: 1, kind: input, shape index: {}]   ;;  %s982_s2 = inlined_call_operand.vmem [shape: f32[2,4,8,8], index: 2, kind: input, shape index: {}]   ;;  %s983_s3 = inlined_call_operand.vmem [shape: f32[4,8,128], index: 3, kind: input, shape index: {}]   ;;  %s984_s4 = inlined_call_operand.vmem [shape: f32[1,128], index: 4, kind: input, shape index: {}]   ;;  %s985_s5 = inlined_call_operand.hbm [shape: f32[2,8,128], index: 5, kind: output, shape index: {}]  }
   0x1   :  { %12 = vsyncpa [#allocation4 + $0x1], 0  ;;  %s830_s18 = smov 0   ;;  %s832_s19 = smov 0  }
   0x2   :  { %s834_s20 = smov 0   ;;  %s836_s21 = smov 0  }
   0x3   :  { %s838_s22 = smov 0   ;;  %s840_s23 = smov 0  }
   0x4   :  { %s842_s24 = smov 0   ;;  %s844_s25 = smov 0  }
   0x5 LB: > { %992 = sst [smem:[#allocation6_spill]] %s777_s20  ;;  %s603_s26 = sadd.s32 4294967295, %s797_s25   ;;  %s797_s25 = sphi %s844_s25, %s18_s25   ;;  %s793_s24 = sphi %s842_s24, %s1008_s24   ;;  %s789_s23 = sphi %s840_s23, %s1007_s23   ;;  %s785_s22 = sphi %s838_s22, %s1006_s22   ;;  %s781_s21 = sphi %s836_s21, %s1005_s21   ;;  %s777_s20 = sphi %s834_s20, %s1004_s20   ;;  %s773_s19 = sphi %s832_s19, %s1010_s19   ;;  %s769_s18 = sphi %s830_s18, %s1009_s18  }
   0x6   : > { %993 = sst [smem:[#allocation7_spill]] %s789_s23  ;;  %s604_s27 = sadd.s32 4294967294, %s797_s25  }
   0x7   : > { %994 = sst [smem:[#allocation8_spill]] %s793_s24  ;;  %s30_s28 = sadd.s32 1, %s789_s23 }
   0x8   : > { %p31_p0 = scmp.ge.s32.totalorder %s30_s28, 4  ;;  %s37_s29 = sadd.s32 1, %s793_s24 }
   0x9   : > { %p189_p1 = scmp.ne.s32.totalorder %s777_s20, %s773_s19  ;;  %p190_p2 = scmp.eq.s32.totalorder %s603_s26, 7 }
   0xa   : > { %s1012_s28 = smov (%p31_p0, %s30_s28), 0  ;;  %s1014_s29 = smov (!%p31_p0, %s37_s29), %s793_s24 }
   0xb   : > { %995 = sst [smem:[#allocation9_spill]] %s1012_s28  ;;  %p879_p3 = por %p190_p2, %p189_p1 }
   0xc   : > { %p195_p4 = scmp.ne.s32.totalorder %s773_s19, %s769_s18  ;;  %p39_p5 = scmp.ge.s32.totalorder %s1014_s29, 2 }
   0xd   : > { %p196_p6 = scmp.eq.s32.totalorder %s604_s27, 7  ;;  %p607_p7 = scmp.ge.s32.totalorder %s797_s25, 1 }
   0xe   : > { %p260_p8 = scmp.lt.s32.totalorder %s797_s25, 9  ;;  %s1016_s29 = smov (%p39_p5, %s1014_s29), 0 }
   0xf   : > { %997 = sst [smem:[#allocation10_spill]] %s1016_s29  ;;  %p889_p9 = por %p196_p6, %p195_p4 }
  0x10   : > { %p261_p10 = pnand %p607_p7, %p260_p8  ;;  %s174_s7 = ssub.s32 %s793_s24, %s1016_s29 }
  0x11   : > { %s998_s6 = scalar_select %p889_p9, 1, 0 }
  0x12   : > { %s179_s8 = sadd.s32 1, %s777_s20  ;;  %p177_p11 = scmp.eq.s32.totalorder %s174_s7, 0 }
  0x13   : > { %999 = sst [smem:[#allocation11_spill]] %s998_s6  ;;  %264 = sbr.rel (%p261_p10) target bundleno = 587 (0x24b), region = 40 }
  0x14   : > { %s897_s9 = scalar_select %p177_p11, %s777_s20, %s179_s8  }
  0x15   : > { %s989_s10 = sand.u32 (!%p261_p10), 1, %s773_s19   ;;  %p314_p12 = scmp.lt.s32.totalorder (!%p261_p10), %s785_s22, 1 }
  0x16   : > { %1000 = sst [smem:[#allocation12_spill]] %s897_s9  ;;  %s903_s11 = sshll.u32 (!%p261_p10), %s989_s10, 3 }
  0x17   : > { %p316_p13 = scmp.lt.s32.totalorder (!%p261_p10), %s781_s21, 3  ;;  %p616_p0 = scmp.ne.s32.totalorder (!%p261_p10), %s781_s21, 0 }
  0x18   : > { %s315_s12 = scalar_select %p314_p12, %s785_s22, 1 }
  0x19   : > { %s317_s13 = scalar_select %p316_p13, %s781_s21, 3 }
  0x1a   : > { %s609_s14 = sshll.u32 %s315_s12, 2  ;;  %s313_s12 = scalar_lea.vmem [#allocation3], %s903_s11 }
  0x1b   : > { %s322_s15 = sadd.s32 %s609_s14, %s317_s13  ;;  %s615_s16 = sshll.u32 %s317_s13, 3 }
  0x1c   : > { %s610_s17 = sshll.u32 %s322_s15, 3  ;;  %s344_s7 = scalar_lea.vmem %s983_s3, %s615_s16 }
  0x1d   : > { %s324_s28 = scalar_lea.vmem %s980_s0, %s610_s17  ;;  %s332_s10 = scalar_lea.vmem %s981_s1, %s610_s17 }
  0x1e   : > { %s340_s6 = scalar_lea.vmem %s982_s2, %s610_s17  ;;  %348 = sbr.rel (%p616_p0) target bundleno = 37 (0x25), region = 44 }
  0x23   : > { %v799_v0 = vmov 0.0  }
  0x24   : > { %349 = vst [vmem:[#allocation2] sm:$0xff] %v799_v0 }
  0x25 PF: > { %v351_v1 = vld [vmem:[%s332_s10] sm:$0xff]  ;;  %vm353_vm0 = vcmask 64512   ;;  %p621_p1 = scmp.ne.s32.totalorder %s781_s21, 3 }
  0x26   : > { %617 = vmatpush.xpose.msk.msra.mxu0 %vm353_vm0, %v351_v1  ;;  %v350_v2 = vld [vmem:[%s324_s28] sm:$0xff] }
  0x27   : > { %v352_v5 = vld [vmem:[%s340_s6] sm:$0xff] }
  0x28   : > { %411 = vmatpush.msra.mxu1 %v352_v5  ;;  %v418_v11 = vld [vmem:[%s344_s7] sm:$0xff] }
  0x29   : > { %618 = vmatmul.msk.f32.vlgmr.msra.gmra.mxu0 %vm353_vm0, %v350_v2  ;;  %437 = vmatpush.msra.mxu2 %v418_v11 }
  0x2b   : > { %v417_v19 = vld [vmem:[#allocation2] sm:$0xff] }
  0xa6   : > { %v377_v3 = vpop.f32.mrf.mxu0 }
  0xa7   : > { %v380_v4 = vsel %vm353_vm0, %v377_v3, -inf }
  0xa8   : > { %381 = vmax.xlane.f32.xlu0 %v380_v4 }
 0x11b   : > { %v382_v6 = vpop.xlane.xlu0 %381 }
 0x11c   : > { %v383_v7 = vsub.f32 %v377_v3, %v382_v6 }
 0x11e   : > { %v384_v8 = vmul.f32 1.442695, %v383_v7 }
 0x120   : > { %698 = vpow2.f32 %v384_v8 }
 0x126   : > { %v699_v9 = vpop.eup %698 }
 0x127   : > { %619 = vmatmul.msk.f32.vlgmr.msra.gmra.mxu1 %vm353_vm0, %v699_v9  ;;  %v386_v10 = vsel %vm353_vm0, %v699_v9, 0.0 }
 0x128   : > { %387 = vadd.xlane.f32.xlu0 %v386_v10 }
 0x19b   : > { %v388_v12 = vpop.xlane.xlu0 %387 }
 0x19c   : > { %700 = vrcp.f32 %v388_v12 }
 0x1a2   : > { %v701_v13 = vpop.eup %700 }
 0x1a3   : > { %v390_v14 = vmul.f32 %v701_v13, %v388_v12 }
 0x1a4   : > { %v413_v17 = vpop.f32.mrf.mxu1 }
 0x1a5   : > { %v391_v15 = vsub.f32 2.0, %v390_v14 }
 0x1a7   : > { %v392_v16 = vmul.f32 %v701_v13, %v391_v15 }
 0x1a9   : > { %v416_v18 = vmul.f32 %v413_v17, %v392_v16 }
 0x1ab   : > { %620 = vmatmul.msk.f32.vlgmr.msra.gmra.mxu2 %vm353_vm0, %v416_v18 }
 0x22d   : > { %447 = sbr.rel (%p621_p1) target bundleno = 572 (0x23c), region = 48 }
 0x22e   : > { %v439_v20 = vpop.f32.mrf.mxu2 }
 0x22f   : > { %v442_v21 = vadd.f32 %v439_v20, %v417_v19 }
 0x231   : > { %443 = vst [vmem:[#allocation2] sm:$0xff] %v442_v21 }
 0x232   : > { %v702_v23 = vld [vmem:[%s984_s4] ss:$0 sm:$0xff] }
 0x238   : > { %v448_v22 = vld [vmem:[#allocation2] sm:$0xff] }
 0x239   : > { %v453_v24 = vadd.f32 %v702_v23, %v448_v22 }
 0x23b   : > { %454 = vst [vmem:[%s313_s12] sm:$0xff] %v453_v24 }
 0x23c PF: > { %s623_s24 = sshll.u32 %s785_s22, 3  ;;  %s469_s6 = sshll.u32 %s313_s12, 4  ;;  %s470_s6 = int_to_ptr.vmem [resolvable:$true] %s469_s6 }
 0x23d   : > { %s467_s21 = scalar_lea.hbm %s985_s5, %s623_s24  ;;  %s1001_s10 = sand.u32 1, %s773_s19  }
 0x23e   : > { %s471_s9 = sshll.u32 %s467_s21, 4  ;;  %s456_s13 = scalar_lea.sflag [#allocation4], %s1001_s10  ;;  %s472_s9 = int_to_ptr.hbm [resolvable:$true] %s471_s9 }
 0x23f   : > { %s717_s14 = sshra.s32 %s472_s9, 4  ;;  %s723_s17 = scalar_lea.hbm %s985_s5, 16  ;;  %s718_s14 = int_to_ptr.hbm [resolvable:$true] %s717_s14 }
 0x240   : > { %s719_s15 = scalar_lea.hbm %s718_s14, 8  ;;  %p724_p6 = scmp.lt.s32.totalorder %s718_s14, %s985_s5 }
 0x241   : > { %p720_p2 = scmp.ne.s32.totalorder %s718_s14, %s719_s15  ;;  %p725_p7 = scmp.lt.s32.totalorder %s723_s17, %s719_s15 }
 0x243   : > { %p721_p4 = pnand %p720_p2, %p879_p3  ;;  %p726_p8 = por %p725_p7, %p724_p6 }
 0x245   : > { %p722_p5 = pneg %p721_p4 }
 0x247   : > { %p727_p10 = pnand %p726_p8, %p722_p5 }
 0x249   : > { %730 = shalt.err (!%p727_p10)
}
 0x24a   : > { %626 = dma.vmem_to_hbm [thread:$0]  (%p879_p3), %s470_s6, 128, %s472_s9, %s456_s13  }
 0x24b PF: > { %p632_p11 = scmp.ge.s32.totalorder %s797_s25, 2  ;;  %s483_s7 = sand.u32 1, %s769_s18  }
 0x24c   : > { %s484_s8 = scalar_lea.sflag [#allocation4], %s483_s7 }
 0x24d   : > { %p629_p12 = pnand %p632_p11, %p889_p9 }
 0x24f   : > { %p630_p13 = pneg %p629_p12 }
 0x251   : > { %764 = dma.done.wait (%p630_p13), %s484_s8, 128  }
 0x252   : > { %766 = vsyncadd (%p630_p13), %s484_s8, 4294967168  ;;  %s18_s25 = sadd.s32 1, %s797_s25   ;;  %s1003_s12 = sld [smem:[#allocation6_spill]] }
 0x253   : > { %p15_p0 = scmp.ge.s32.totalorder %s18_s25, 10   ;;  %s1004_s20 = sld [smem:[#allocation12_spill]] }
 0x254   : > { %s1005_s21 = sld [smem:[#allocation7_spill]]  ;;  %s1009_s18 = smov %s773_s19 }
 0x255   : > { %s1006_s22 = sld [smem:[#allocation8_spill]]  ;;  %17 = sbr.rel (!%p15_p0) target bundleno = 5 (0x5), region = 92 }
 0x256   : > { %s1007_s23 = sld [smem:[#allocation9_spill]] }
 0x257   : > { %s1008_s24 = sld [smem:[#allocation10_spill]] }
 0x258   : > { %s1010_s19 = smov %s1003_s12 }
 0x25a   :  { %490 = vsyncpa [#allocation4], 1 }
 0x25b   :  { %492 = vsyncpa [#allocation4 + $0x1], 1 }

</bundles_post_ra>
